<compile_context>
chip_gen: v7x
topology: tpu7x:2x2x1
jax: 0.10.0
libtpu: 0.0.40
codegen_flags: <defaults>
</compile_context>

<pallas_src>
import jax
import jax.numpy as jnp
from jax.experimental import pallas as pl
from jax.experimental.pallas import tpu as pltpu


def _round_up(n, m):
    return ((n + m - 1) // m) * m


def _patch_embed_kernel(p_ref, w_ref, b_ref, o_ref):
    # p_ref: (TM, K_pad) bf16, w_ref: (K_pad, E_pad) bf16 (resident),
    # b_ref: (1, E_pad) f32 (resident), o_ref: (TM, E_pad).
    acc = jnp.dot(p_ref[...], w_ref[...], preferred_element_type=jnp.float32)
    o_ref[...] = (acc + b_ref[...]).astype(o_ref.dtype)


def box_embedder_forward(x, weight, bias, img_size, *, tile_m=512):
    """x: (B, 3, H, W) NCHW; weight: (E, 3, P, P); bias: (E,). Returns (B, num_patches, E)."""
    B, C, H, W = x.shape
    P = img_size
    assert H % P == 0 and W % P == 0
    PH, PW = H // P, W // P
    E = weight.shape[0]
    K = C * P * P
    M = B * PH * PW

    # Alignment: K to the MXU contraction width, E to the 128-lane width.
    K_pad = _round_up(K, 256)
    E_pad = _round_up(E, 128)

    # M tile: largest of tile_m that is useful; always a multiple of 8 (sublane).
    TM = min(tile_m, _round_up(M, 8))
    M_pad = _round_up(M, TM)

    compute_dtype = jnp.bfloat16
    out_dtype = x.dtype

    # Rearrange to patch rows with flatten order (c, kh, kw), matching Conv2d's
    # (oc, c, kh, kw) weight layout.  Pure reshape (free) when H == W == img_size.
    patches = (
        x.reshape(B, C, PH, P, PW, P)
        .transpose(0, 2, 4, 1, 3, 5)      # (B, PH, PW, C, P, P)
        .reshape(M, K)
    )
    patches = jnp.pad(patches, ((0, M_pad - M), (0, K_pad - K))).astype(compute_dtype)

    w_k = weight.reshape(E, K).T                                   # (K, E)
    w_k = jnp.pad(w_k, ((0, K_pad - K), (0, E_pad - E))).astype(compute_dtype)
    b_k = jnp.pad(bias.reshape(1, E), ((0, 0), (0, E_pad - E))).astype(jnp.float32)

    grid = (M_pad // TM,)

    out = pl.pallas_call(
        _patch_embed_kernel,
        out_shape=jax.ShapeDtypeStruct((M_pad, E_pad), out_dtype),
        grid_spec=pltpu.PrefetchScalarGridSpec(
            num_scalar_prefetch=0,
            grid=grid,
            in_specs=[
                pl.BlockSpec((TM, K_pad), lambda i: (i, 0)),        # streamed patch tile
                pl.BlockSpec((K_pad, E_pad), lambda i: (0, 0)),     # resident weight
                pl.BlockSpec((1, E_pad), lambda i: (0, 0)),         # resident bias
            ],
            out_specs=pl.BlockSpec((TM, E_pad), lambda i: (i, 0)),  # streamed output tile
        ),
        compiler_params=pltpu.CompilerParams(
            dimension_semantics=("parallel",),          # megacore-shard M tiles (v7x)
            vmem_limit_bytes=64 << 20,                  # allow large TM tiles on v5e/v6e
            allow_input_fusion=[True, False, False],    # fuse patch rearrange into input DMA
        ),
    )(patches, w_k, b_k)

    out = out[:M, :E]
    # Equivalent of Conv2d -> flatten(2) -> transpose(1, 2): patch index = ph*PW + pw.
    return out.reshape(B, PH * PW, E)


if __name__ == "__main__":
    # Small shapes consistent with the module: B=2, C=3 (fixed by Conv2d(3, ...)),
    # H=W=16, img_size (patch) = 8 -> num_patches = 4, embed_dim = 32.
    B, C, H, W = 2, 3, 16, 16
    img_size = 8
    embed_dim = 32

    key = jax.random.PRNGKey(0)
    kx, kw, kb = jax.random.split(key, 3)

    x = jax.random.normal(kx, (B, C, H, W), dtype=jnp.float32)
    weight = jax.random.normal(kw, (embed_dim, C, img_size, img_size), dtype=jnp.float32) * 0.02
    bias = jax.random.normal(kb, (embed_dim,), dtype=jnp.float32) * 0.02

    out = box_embedder_forward(x, weight, bias, img_size)
    out = jax.block_until_ready(out)

    PH, PW = H // img_size, W // img_size
    assert out.shape == (B, PH * PW, embed_dim), out.shape

    # Pure-JAX reference (patch-wise linear == Conv2d with kernel == stride).
    ref_patches = (
        x.reshape(B, C, PH, img_size, PW, img_size)
        .transpose(0, 2, 4, 1, 3, 5)
        .reshape(B * PH * PW, C * img_size * img_size)
    )
    ref = (ref_patches @ weight.reshape(embed_dim, -1).T + bias).reshape(B, PH * PW, embed_dim)
    max_err = float(jnp.max(jnp.abs(out - ref)))
    assert max_err < 5e-2, f"max_err={max_err}"  # loose tol: bf16 operands, f32 accumulation

    print("KERNEL_OK")
</pallas_src>

<mosaic_0001>
module attributes {stable_mosaic.version = 11 : i64} {
  func.func @_patch_embed_kernel(%arg0: i32, %arg1: memref<8x256xbf16, #tpu.memory_space<vmem>>, %arg2: memref<256x128xbf16, #tpu.memory_space<vmem>>, %arg3: memref<1x128xf32, #tpu.memory_space<vmem>>, %arg4: memref<8x128xf32, #tpu.memory_space<vmem>>) attributes {dimension_semantics = [#tpu.dimension_semantics<parallel>], iteration_bounds = array<i64: 1>, scalar_prefetch = 0 : i64, scratch_operands = 0 : i64, tpu.core_type = #tpu.core_type<tc>, window_params = [{transform_indices = @transform_0, window_bounds = array<i64: 8, 256>}, {pipeline_mode = #tpu.pipeline_mode<synchronous>, transform_indices = @transform_1, window_bounds = array<i64: 256, 128>}, {pipeline_mode = #tpu.pipeline_mode<synchronous>, transform_indices = @transform_2, window_bounds = array<i64: 1, 128>}, {transform_indices = @transform_3, window_bounds = array<i64: 8, 128>}]} {
    %c0 = arith.constant 0 : index
    %c0_0 = arith.constant 0 : index
    %0 = vector.load %arg1[%c0, %c0_0] : memref<8x256xbf16, #tpu.memory_space<vmem>>, vector<8x256xbf16>
    %c0_1 = arith.constant 0 : index
    %c0_2 = arith.constant 0 : index
    %1 = vector.load %arg2[%c0_1, %c0_2] : memref<256x128xbf16, #tpu.memory_space<vmem>>, vector<256x128xbf16>
    %cst = arith.constant dense<0.000000e+00> : vector<8x128xf32>
    %2 = tpu.matmul %0, %1, %cst {dimension_numbers = #tpu.dot_dimension_numbers<[1], [0], [0], [1], [0, 0, 1, 1], [], []>} : vector<8x256xbf16>, vector<256x128xbf16>, vector<8x128xf32> -> vector<8x128xf32>
    %c0_3 = arith.constant 0 : index
    %c0_4 = arith.constant 0 : index
    %3 = vector.load %arg3[%c0_3, %c0_4] : memref<1x128xf32, #tpu.memory_space<vmem>>, vector<1x128xf32>
    %4 = vector.broadcast %3 : vector<1x128xf32> to vector<8x128xf32>
    %5 = arith.addf %2, %4 : vector<8x128xf32>
    %c0_5 = arith.constant 0 : index
    %c0_6 = arith.constant 0 : index
    %6 = vector.load %arg4[%c0_5, %c0_6] : memref<8x128xf32, #tpu.memory_space<vmem>>, vector<8x128xf32>
    tpu.vector_store %arg4[%c0_5, %c0_6], %5 {strides = array<i32>} : memref<8x128xf32, #tpu.memory_space<vmem>>, vector<8x128xf32>,
    return
  }
  func.func @transform_0(%arg0: i32) -> (i32, i32) {
    %c0_i32 = arith.constant 0 : i32
    %c0_i32_0 = arith.constant 0 : i32
    return %arg0, %c0_i32 : i32, i32
  }
  func.func @transform_1(%arg0: i32) -> (i32, i32) {
    %c0_i32 = arith.constant 0 : i32
    %c0_i32_0 = arith.constant 0 : i32
    %c0_i32_1 = arith.constant 0 : i32
    return %c0_i32, %c0_i32_0 : i32, i32
  }
  func.func @transform_2(%arg0: i32) -> (i32, i32) {
    %c0_i32 = arith.constant 0 : i32
    %c0_i32_0 = arith.constant 0 : i32
    %c0_i32_1 = arith.constant 0 : i32
    return %c0_i32, %c0_i32_0 : i32, i32
  }
  func.func @transform_3(%arg0: i32) -> (i32, i32) {
    %c0_i32 = arith.constant 0 : i32
    %c0_i32_0 = arith.constant 0 : i32
    return %arg0, %c0_i32 : i32, i32
  }
}

</mosaic_0001>

<bundles_post_ra>
// kernel: tpu_custom_call.1
= control target key start
LH: loop header
LB: loop body
LE: loop exit
PB: predicated region body
PF: predicated region fallthrough
CT: control target
= control target key end

     0   :  { %8 = vsyncpa [#allocation3], 0  ;;  %s486_s0 = inlined_call_operand.hbm [shape: bf16[8,256], index: 0, kind: input, shape index: {}]   ;;  %s487_s1 = inlined_call_operand.hbm [shape: bf16[256,128], index: 1, kind: input, shape index: {}]   ;;  %s488_s2 = inlined_call_operand.hbm [shape: f32[1,128], index: 2, kind: input, shape index: {}]   ;;  %s489_s3 = inlined_call_operand.hbm [shape: f32[8,128], index: 3, kind: output, shape index: {}]  }
   0x1   :  { %9 = vsyncpa [#allocation6], 0 }
   0x2   :  { %10 = vsyncpa [#allocation4], 0  ;;  %s412_s12 = smov [#allocation5]   ;;  %s318_s16 = scalar_lea.hbm %s487_s1, 2048 }
   0x3   :  { %s26_s13 = sshll.u32 %s412_s12, 4  ;;  %p319_p0 = scmp.ne.s32.totalorder %s487_s1, %s318_s16  ;;  %s27_s13 = int_to_ptr.vmem [resolvable:$true] %s26_s13 }
   0x4   :  { %p322_p1 = scmp.lt.u32.totalorder %s318_s16, %s487_s1 }
   0x6   :  { %p324_p2 = pnand %p322_p1, %p319_p0 }
   0x8   :  { %327 = shalt.err (!%p324_p2)
}
   0x9   :  { %s328_s21 = scalar_lea.vmem %s27_s13, 2048  ;;  %p333_p4 = scmp.lt.s32.totalorder %s27_s13, %s27_s13 }
   0xa   :  { %p329_p3 = scmp.ne.s32.totalorder %s27_s13, %s328_s21  ;;  %p334_p5 = scmp.lt.s32.totalorder %s328_s21, %s328_s21 }
   0xc   :  { %p335_p6 = por %p334_p5, %p333_p4 }
   0xe   :  { %p336_p7 = pnand %p335_p6, %p329_p3 }
  0x10   :  { %339 = shalt.err (!%p336_p7)
}
  0x11   :  { %s413_s22 = smov 64   ;;  %s414_s23 = smov 4  }
  0x12   :  { %32 = dma.hbm_to_vmem [thread:$0]  %s487_s1, 2048, %s27_s13, [#allocation6], %s413_s22, %s413_s22, %s414_s23  }
  0x13   :  { %s415_s26 = smov [#allocation2]   ;;  %s416_s28 = smov [#allocation7]  }
  0x14   :  { %s17_s27 = sshll.u32 %s415_s26, 4  ;;  %s39_s29 = sshll.u32 %s416_s28, 4  ;;  %s18_s27 = int_to_ptr.vmem [resolvable:$true] %s17_s27  ;;  %s40_s29 = int_to_ptr.vmem [resolvable:$true] %s39_s29 }
  0x15   :  { %s340_s5 = scalar_lea.hbm %s486_s0, 128 }
  0x16   :  { %p341_p8 = scmp.ne.s32.totalorder %s486_s0, %s340_s5  ;;  %p344_p9 = scmp.lt.u32.totalorder %s340_s5, %s486_s0 }
  0x18   :  { %p346_p10 = pnand %p344_p9, %p341_p8 }
  0x1a   :  { %349 = shalt.err (!%p346_p10)
}
  0x1b   :  { %s350_s1 = scalar_lea.vmem %s18_s27, 128  ;;  %p355_p12 = scmp.lt.s32.totalorder %s18_s27, %s18_s27 }
  0x1c   :  { %p351_p11 = scmp.ne.s32.totalorder %s18_s27, %s350_s1  ;;  %p356_p13 = scmp.lt.s32.totalorder %s350_s1, %s350_s1 }
  0x1e   :  { %p357_p0 = por %p356_p13, %p355_p12 }
  0x20   :  { %p358_p1 = pnand %p357_p0, %p351_p11 }
  0x22   :  { %361 = shalt.err (!%p358_p1)
}
  0x23   :  { %20 = dma.hbm_to_vmem [thread:$0]  %s486_s0, 128, %s18_s27, [#allocation3]  }
  0x24   :  { %s362_s14 = scalar_lea.hbm %s488_s2, 16 }
  0x25   :  { %p363_p2 = scmp.ne.s32.totalorder %s488_s2, %s362_s14  ;;  %p366_p3 = scmp.lt.u32.totalorder %s362_s14, %s488_s2 }
  0x27   :  { %p368_p4 = pnand %p366_p3, %p363_p2 }
  0x29   :  { %371 = shalt.err (!%p368_p4)
}
  0x2a   :  { %s372_s19 = scalar_lea.vmem %s40_s29, 16  ;;  %s376_s20 = scalar_lea.vmem %s40_s29, 32 }
  0x2b   :  { %p373_p5 = scmp.ne.s32.totalorder %s40_s29, %s372_s19  ;;  %p377_p6 = scmp.lt.s32.totalorder %s40_s29, %s40_s29 }
  0x2c   :  { %p378_p7 = scmp.lt.s32.totalorder %s376_s20, %s372_s19 }
  0x2e   :  { %p379_p8 = por %p378_p7, %p377_p6 }
  0x30   :  { %p380_p9 = pnand %p379_p8, %p373_p5 }
  0x32   :  { %383 = shalt.err (!%p380_p9)
}
  0x33   :  { %42 = dma.hbm_to_vmem [thread:$0]  %s488_s2, 16, %s40_s29, [#allocation6]  }
  0x34   :  { %406 = dma.done.wait [#allocation3], 128  }
  0x35   :  { %407 = vsyncadd [#allocation3], 4294967168 }
  0x36   :  { %408 = dma.done.wait [#allocation6], 2064  }
  0x37   :  { %409 = vsyncadd [#allocation6], 4294965232  ;;  %v300_v0 = vld [vmem:[#allocation5 + $0x40] sm:$0xff]   ;;  %v302_v2 = vld [vmem:[#allocation5 + $0x48] sm:$0xff]   ;;  %s417_s2 = smov [#allocation8]  }
  0x38   :  { %v301_v1 = vld [vmem:[#allocation5] sm:$0xff]   ;;  %272 = vmatprep.subr.bf16.mxu0 %v300_v0  ;;  %v303_v3 = vld [vmem:[#allocation5 + $0x8] sm:$0xff]   ;;  %v304_v4 = vld [vmem:[#allocation5 + $0x50] sm:$0xff]   ;;  %s243_s22 = sshll.u32 %s417_s2, 4  ;;  %s244_s22 = int_to_ptr.vmem [resolvable:$true] %s243_s22 }
  0x39   :  { %273 = vmatpush3.bf16.msra.mxu0 %v301_v1  ;;  %v305_v5 = vld [vmem:[#allocation5 + $0x10] sm:$0xff]   ;;  %v306_v6 = vld [vmem:[#allocation5 + $0x58] sm:$0xff]   ;;  %v308_v8 = vld [vmem:[#allocation5 + $0x60] sm:$0xff]   ;;  %s384_s23 = scalar_lea.vmem %s244_s22, 128  ;;  %p389_p11 = scmp.lt.s32.totalorder %s244_s22, %s244_s22 }
  0x3a   :  { %274 = vmatprep.subr.bf16.mxu0 %v302_v2  ;;  %v307_v7 = vld [vmem:[#allocation5 + $0x18] sm:$0xff]   ;;  %v309_v9 = vld [vmem:[#allocation5 + $0x20] sm:$0xff]   ;;  %v310_v10 = vld [vmem:[#allocation5 + $0x68] sm:$0xff]   ;;  %p385_p10 = scmp.ne.s32.totalorder %s244_s22, %s384_s23  ;;  %p390_p12 = scmp.lt.s32.totalorder %s384_s23, %s384_s23 }
  0x3b   :  { %v53_v11 = vld [vmem:[#allocation2] sm:$0xff]  ;;  %v311_v13 = vld [vmem:[#allocation5 + $0x28] sm:$0xff]   ;;  %v312_v14 = vld [vmem:[#allocation5 + $0x70] sm:$0xff]  }
  0x3c   :  { %v255_v12 = vcombine.high %v53_v11, %v53_v11  ;;  %v313_v15 = vld [vmem:[#allocation5 + $0x30] sm:$0xff]   ;;  %v314_v16 = vld [vmem:[#allocation5 + $0x78] sm:$0xff]   ;;  %v254_v18 = vcombine.low %v53_v11, %v53_v11  ;;  %v253_v20 = vld [vmem:[#allocation7] ss:$0 sm:$0xff]  ;;  %p391_p13 = por %p390_p12, %p389_p11 }
  0x3d   :  { %275 = vmatpush3.bf16.msra.mxu0 %v303_v3  ;;  %v315_v17 = vld [vmem:[#allocation5 + $0x38] sm:$0xff]  }
  0x3e   :  { %276 = vmatprep.subr.bf16.mxu0 %v304_v4  ;;  %228 = vmatprep.mubr.bf16.mxu0 %v255_v12  ;;  %p392_p0 = pnand %p391_p13, %p385_p10 }
  0x41   :  { %277 = vmatpush3.bf16.msra.mxu0 %v305_v5 }
  0x42   :  { %278 = vmatprep.subr.bf16.mxu0 %v306_v6 }
  0x45   :  { %279 = vmatpush3.bf16.msra.mxu0 %v307_v7 }
  0x46   :  { %280 = vmatprep.subr.bf16.mxu0 %v308_v8 }
  0x49   :  { %281 = vmatpush3.bf16.msra.mxu0 %v309_v9 }
  0x4a   :  { %282 = vmatprep.subr.bf16.mxu0 %v310_v10 }
  0x4d   :  { %283 = vmatpush3.bf16.msra.mxu0 %v311_v13 }
  0x4e   :  { %284 = vmatprep.subr.bf16.mxu0 %v312_v14 }
  0x51   :  { %285 = vmatpush3.bf16.msra.mxu0 %v313_v15 }
  0x52   :  { %286 = vmatprep.subr.bf16.mxu0 %v314_v16 }
  0x55   :  { %287 = vmatpush3.bf16.msra.mxu0 %v315_v17 }
  0x58   :  { %229 = vmatmul.mubr.bf16.vlgmr.msra.gmra.mrb[0].mxu0 %v254_v18 }
 0x12b   :  { %v288_v19 = vpop.f32.mrb[0].mxu0 }
 0x12c   :  { %v289_v21 = vpop.f32.mrb[1].mxu0 }
 0x12d   :  { %v290_v22 = vadd.f32 %v289_v21, %v288_v19  ;;  %v291_v23 = vpop.f32.mrb[2].mxu0 }
 0x12e   :  { %v292_v24 = vpop.f32.mrb[3].mxu0 }
 0x12f   :  { %v231_v25 = vadd.f32 %v290_v22, %v253_v20 }
 0x131   :  { %236 = vst [vmem:[#allocation8] sm:$0xff] %v231_v25 }
 0x132   :  { %395 = shalt.err (!%p392_p0)
}
 0x133   :  { %s396_s26 = scalar_lea.hbm %s489_s3, 128 }
 0x134   :  { %p397_p1 = scmp.ne.s32.totalorder %s489_s3, %s396_s26  ;;  %p400_p2 = scmp.lt.u32.totalorder %s396_s26, %s489_s3 }
 0x136   :  { %p402_p3 = pnand %p400_p2, %p397_p1 }
 0x138   :  { %405 = shalt.err (!%p402_p3)
}
 0x139   :  { %246 = dma.vmem_to_hbm [thread:$0]  %s244_s22, 128, %s489_s3, [#allocation4]  }
 0x13a   :  { %410 = dma.done.wait [#allocation4], 128  }
 0x13b   :  { %411 = vsyncadd [#allocation4], 4294967168 }
 0x13c   :  { %250 = vsyncpa [#allocation3], 1 }
 0x13d   :  { %251 = vsyncpa [#allocation6], 1 }
 0x13e   :  { %252 = vsyncpa [#allocation4], 1 }

</bundles_post_ra>
